<compile_context>
chip_gen: v6e
topology: v6e:2x2x1
jax: 0.10.0
libtpu: 0.0.40
codegen_flags: <defaults>
</compile_context>

<pallas_src>
import functools

import jax
import jax.numpy as jnp
from jax.experimental import pallas as pl
from jax.experimental.pallas import tpu as pltpu

SONG_PIECE_SIZE = 16
HIDDEN_SIZE = 32
BATCH = 8          # multiple of 8 -> every per-step slice is sublane aligned
SEQ_STEPS = 8      # song pieces per sequence (forward_D loop, fused)
NUM_SEQS = 2       # independent sequences per call -> "parallel" grid axis


def _disc_seq_kernel(B, H, T, pairwise,
                     x_ref, h0_ref, wxh_ref, whh_ref, wox_ref, woh_ref,
                     bh_ref, bo_ref, out_ref, hfin_ref):
    """One independent sequence per grid step.

    x_ref   : (T*B, P)  inputs, step-major; time-permuted [evens; odds] if pairwise
    h0_ref  : (B, H)    initial hidden
    wxh_ref : (P, H)    x-rows of Wh
    whh_ref : (H, H)    h-rows of Wh
    wox_ref : (1, P)    x-rows of Wo as a row vector
    woh_ref : (1, H)    h-rows of Wo as a row vector
    bh_ref  : (1, H)    f_hidden bias
    bo_ref  : (1, 1)    f_output bias
    out_ref : (T*B, 1)  sigmoid outputs (same step order as x_ref)
    hfin_ref: (B, H)    final hidden state
    """
    f32 = jnp.float32
    x = x_ref[...]                       # (T*B, P)
    whh = whh_ref[...]                   # (H, H) stays in vregs

    # Bulk x-contribution of f_hidden for every step; bias folded in ONCE here.
    xh = jnp.dot(x, wxh_ref[...], preferred_element_type=f32) + bh_ref[...]   # (T*B, H)
    # x-contribution of f_output: VPU multiply + XLU lane-reduce (MXU stays free).
    xo = jnp.sum(x * wox_ref[...], axis=-1, keepdims=True) + bo_ref[...]      # (T*B, 1)

    h0 = h0_ref[...]
    if pairwise:
        # 2-step affine hop: halves the number of dependent MXU latencies.
        thalf = T // 2
        hb = thalf * B
        xh_even, xh_odd = xh[:hb], xh[hb:]
        whh2 = jnp.dot(whh, whh, preferred_element_type=f32)                  # (H, H)
        g2 = jnp.dot(xh_even, whh, preferred_element_type=f32) + xh_odd       # (hb, H)
        h = h0
        evens = [h0]                      # pre-update hiddens of even steps
        for k in range(thalf):            # serial chain: thalf dots, whh2 stationary RHS
            h = jnp.dot(h, whh2, preferred_element_type=f32) + g2[k * B:(k + 1) * B]
            evens.append(h)
        hfin_ref[...] = evens[-1].astype(hfin_ref.dtype)                      # h_T
        h_even = jnp.concatenate(evens[:-1], axis=0)                          # [h0,h2,...]
        # All odd-step hiddens from ONE bulk dot (overlaps the last serial dot).
        h_odd = xh_even + jnp.dot(h_even, whh, preferred_element_type=f32)    # [h1,h3,...]
        hid = jnp.concatenate([h_even, h_odd], axis=0)                        # permuted order
    else:
        # Straight unrolled recurrence (odd T, e.g. the single-step forward()).
        h = h0
        hs = []
        for t in range(T):
            hs.append(h)                  # pre-update hidden used for step t's output
            h = xh[t * B:(t + 1) * B] + jnp.dot(h, whh, preferred_element_type=f32)
        hfin_ref[...] = h.astype(hfin_ref.dtype)
        hid = jnp.concatenate(hs, axis=0)

    # f_output hidden-contribution: VPU multiply + XLU lane-reduce, no N=1 MXU dot.
    logits = xo + jnp.sum(hid * woh_ref[...], axis=-1, keepdims=True)         # (T*B, 1)
    out_ref[...] = jax.nn.sigmoid(logits).astype(out_ref.dtype)


def rnn_discriminator_sequences(x_seqs, h0s, wh, bh, wo, bo):
    """Run G independent discriminator sequences (T song pieces each) in one kernel.

    x_seqs : (G, T, B, SONG_PIECE_SIZE)
    h0s    : (G, B, HIDDEN_SIZE)
    wh     : (P+H, H)   f_hidden weight, transposed vs torch
    bh     : (1, H)
    wo     : (P+H, 1)   f_output weight, transposed vs torch
    bo     : (1, 1)
    returns outputs (G, T, B, 1) and final hiddens (G, B, H)
    """
    G, T, B, P = x_seqs.shape
    H = h0s.shape[-1]
    pairwise = (T % 2 == 0) and T >= 2

    # Split weight rows into x-part / h-part; f_output columns become row vectors.
    wxh = wh[:P]                            # (P, H)
    whh = wh[P:]                            # (H, H)
    wox = wo[:P].reshape(1, P)              # (1, P)
    woh = wo[P:].reshape(1, H)              # (1, H)
    bh2 = bh.reshape(1, H)
    bo2 = bo.reshape(1, 1)

    if pairwise:
        # Time-permute so even steps form the first half, odd steps the second.
        # Pure wrapper-side layout plumbing; keeps kernel slices static & dense.
        x_k = jnp.concatenate([x_seqs[:, 0::2], x_seqs[:, 1::2]], axis=1)
    else:
        x_k = x_seqs
    x_flat = x_k.reshape(G, T * B, P).astype(jnp.float32)
    h0s = h0s.astype(jnp.float32)

    flops = G * (2 * T * B * P * H          # bulk x @ Wxh
                 + 2 * T * B * H * H        # recurrence + odd-hidden dots
                 + 2 * T * B * (P + H)      # f_output VPU path
                 + 2 * H * H * H)           # Whh^2
    cost = pl.CostEstimate(
        flops=int(flops),
        transcendentals=int(G * T * B),     # sigmoid
        bytes_accessed=int(4 * (x_flat.size + h0s.size + wh.size + wo.size
                                + 2 * H + 1 + G * T * B + G * B * H)),
    )

    out_flat, h_final = pl.pallas_call(
        functools.partial(_disc_seq_kernel, B, H, T, pairwise),
        grid=(G,),
        out_shape=(
            jax.ShapeDtypeStruct((G, T * B, 1), jnp.float32),
            jax.ShapeDtypeStruct((G, B, H), jnp.float32),
        ),
        in_specs=[
            pl.BlockSpec((None, T * B, P), lambda g: (g, 0, 0)),   # x   (per sequence)
            pl.BlockSpec((None, B, H), lambda g: (g, 0, 0)),       # h0  (per sequence)
            pl.BlockSpec((P, H), lambda g: (0, 0)),                # wxh (VMEM resident)
            pl.BlockSpec((H, H), lambda g: (0, 0)),                # whh (VMEM resident)
            pl.BlockSpec((1, P), lambda g: (0, 0)),                # wox row
            pl.BlockSpec((1, H), lambda g: (0, 0)),                # woh row
            pl.BlockSpec((1, H), lambda g: (0, 0)),                # bh
            pl.BlockSpec((1, 1), lambda g: (0, 0)),                # bo
        ],
        out_specs=(
            pl.BlockSpec((None, T * B, 1), lambda g: (g, 0, 0)),
            pl.BlockSpec((None, B, H), lambda g: (g, 0, 0)),
        ),
        compiler_params=pltpu.CompilerParams(
            dimension_semantics=("parallel",),     # v7x: split sequences over both TCs
        ),
        cost_estimate=cost,
    )(x_flat, h0s, wxh, whh, wox, woh, bh2, bo2)

    if pairwise:
        thalf = T // 2
        out = out_flat.reshape(G, 2, thalf, B, 1)
        out = jnp.transpose(out, (0, 2, 1, 3, 4)).reshape(G, T, B, 1)  # un-permute time
    else:
        out = out_flat.reshape(G, T, B, 1)
    return out, h_final


def rnn_discriminator_sequence(x_seq, h0, wh, bh, wo, bo):
    """Single sequence: x_seq (T, B, P), h0 (B, H) -> ((T, B, 1), (B, H))."""
    out, hf = rnn_discriminator_sequences(x_seq[None], h0[None], wh, bh, wo, bo)
    return out[0], hf[0]


def rnn_discriminator_forward(x, h, wh, bh, wo, bo):
    """Single step, identical to the torch module's forward(input, hidden)."""
    out, h_new = rnn_discriminator_sequence(x[None], h, wh, bh, wo, bo)
    return out[0], h_new                      # (B, 1), (B, H)


def init_params(key):
    """Deterministic parameter init matching the nn.Linear shapes (stored transposed)."""
    in_dim = SONG_PIECE_SIZE + HIDDEN_SIZE
    k1, k2, k3, k4 = jax.random.split(key, 4)
    bound = 1.0 / jnp.sqrt(in_dim)
    wh = jax.random.uniform(k1, (in_dim, HIDDEN_SIZE), jnp.float32, -bound, bound)
    bh = jax.random.uniform(k2, (1, HIDDEN_SIZE), jnp.float32, -bound, bound)
    wo = jax.random.uniform(k3, (in_dim, 1), jnp.float32, -bound, bound)
    bo = jax.random.uniform(k4, (1, 1), jnp.float32, -bound, bound)
    return wh, bh, wo, bo


if __name__ == "__main__":
    key = jax.random.PRNGKey(0)
    kx, kp = jax.random.split(key)

    x_seqs = jax.random.normal(
        kx, (NUM_SEQS, SEQ_STEPS, BATCH, SONG_PIECE_SIZE), jnp.float32)
    h0s = jnp.zeros((NUM_SEQS, BATCH, HIDDEN_SIZE), jnp.float32)   # initHidden
    wh, bh, wo, bo = init_params(kp)

    # Fused multi-sequence kernel (forward applied SEQ_STEPS times, forward_D style).
    out_seqs, h_finals = rnn_discriminator_sequences(x_seqs, h0s, wh, bh, wo, bo)
    out_seqs = jax.block_until_ready(out_seqs)
    h_finals = jax.block_until_ready(h_finals)

    # Pure-JAX reference mirroring the torch module's per-step forward.
    ref_outs, ref_hfin = [], []
    for g in range(NUM_SEQS):
        h_ref = h0s[g]
        outs_g = []
        for t in range(SEQ_STEPS):
            combined = jnp.concatenate([x_seqs[g, t], h_ref], axis=1)
            outs_g.append(jax.nn.sigmoid(combined @ wo + bo))
            h_ref = combined @ wh + bh
        ref_outs.append(jnp.stack(outs_g, axis=0))
        ref_hfin.append(h_ref)
    ref_outs = jnp.stack(ref_outs, axis=0)          # (G, T, B, 1)
    ref_hfin = jnp.stack(ref_hfin, axis=0)          # (G, B, H)

    assert out_seqs.shape == (NUM_SEQS, SEQ_STEPS, BATCH, 1)
    assert h_finals.shape == (NUM_SEQS, BATCH, HIDDEN_SIZE)
    # 2-step hop reassociates f32 dots (h @ Whh^2 vs (h @ Whh) @ Whh) -> 1e-4 tol.
    assert jnp.allclose(out_seqs, ref_outs, atol=1e-4, rtol=1e-4), "sequence output mismatch"
    assert jnp.allclose(h_finals, ref_hfin, atol=1e-4, rtol=1e-4), "final hidden mismatch"

    # Single-sequence wrapper.
    out_one, h_one = rnn_discriminator_sequence(x_seqs[0], h0s[0], wh, bh, wo, bo)
    out_one = jax.block_until_ready(out_one)
    h_one = jax.block_until_ready(h_one)
    assert jnp.allclose(out_one, ref_outs[0], atol=1e-4, rtol=1e-4)
    assert jnp.allclose(h_one, ref_hfin[0], atol=1e-4, rtol=1e-4)

    # Single-step path (the module's forward) — exercises the straight (odd-T) branch.
    out1, h1 = rnn_discriminator_forward(x_seqs[0, 0], h0s[0], wh, bh, wo, bo)
    out1 = jax.block_until_ready(out1)
    h1 = jax.block_until_ready(h1)
    comb0 = jnp.concatenate([x_seqs[0, 0], h0s[0]], axis=1)
    assert jnp.allclose(out1, jax.nn.sigmoid(comb0 @ wo + bo), atol=1e-5, rtol=1e-5)
    assert jnp.allclose(h1, comb0 @ wh + bh, atol=1e-5, rtol=1e-5)

    print("KERNEL_OK")
</pallas_src>

<mosaic_0001>
module attributes {stable_mosaic.version = 11 : i64} {
  func.func @_disc_seq_kernel(%arg0: i32, %arg1: memref<1x64x16xf32, #tpu.memory_space<vmem>>, %arg2: memref<1x8x32xf32, #tpu.memory_space<vmem>>, %arg3: memref<16x32xf32, #tpu.memory_space<vmem>>, %arg4: memref<32x32xf32, #tpu.memory_space<vmem>>, %arg5: memref<1x16xf32, #tpu.memory_space<vmem>>, %arg6: memref<1x32xf32, #tpu.memory_space<vmem>>, %arg7: memref<1x32xf32, #tpu.memory_space<vmem>>, %arg8: memref<1x1xf32, #tpu.memory_space<vmem>>, %arg9: memref<1x64x1xf32, #tpu.memory_space<vmem>>, %arg10: memref<1x8x32xf32, #tpu.memory_space<vmem>>) attributes {dimension_semantics = [#tpu.dimension_semantics<parallel>], iteration_bounds = array<i64: 2>, scalar_prefetch = 0 : i64, scratch_operands = 0 : i64, tpu.core_type = #tpu.core_type<tc>, window_params = [{transform_indices = @transform_0, window_bounds = array<i64: 1, 64, 16>}, {transform_indices = @transform_1, window_bounds = array<i64: 1, 8, 32>}, {pipeline_mode = #tpu.pipeline_mode<synchronous>, transform_indices = @transform_2, window_bounds = array<i64: 16, 32>}, {pipeline_mode = #tpu.pipeline_mode<synchronous>, transform_indices = @transform_3, window_bounds = array<i64: 32, 32>}, {pipeline_mode = #tpu.pipeline_mode<synchronous>, transform_indices = @transform_4, window_bounds = array<i64: 1, 16>}, {pipeline_mode = #tpu.pipeline_mode<synchronous>, transform_indices = @transform_5, window_bounds = array<i64: 1, 32>}, {pipeline_mode = #tpu.pipeline_mode<synchronous>, transform_indices = @transform_6, window_bounds = array<i64: 1, 32>}, {pipeline_mode = #tpu.pipeline_mode<synchronous>, transform_indices = @transform_7, window_bounds = array<i64: 1, 1>}, {transform_indices = @transform_8, window_bounds = array<i64: 1, 64, 1>}, {transform_indices = @transform_9, window_bounds = array<i64: 1, 8, 32>}]} {
    %c0 = arith.constant 0 : index
    %c0_0 = arith.constant 0 : index
    %c0_1 = arith.constant 0 : index
    %0 = vector.load %arg1[%c0, %c0_0, %c0_1] : memref<1x64x16xf32, #tpu.memory_space<vmem>>, vector<1x64x16xf32>
    %1 = vector.shape_cast %0 : vector<1x64x16xf32> to vector<64x16xf32>
    %c0_2 = arith.constant 0 : index
    %c0_3 = arith.constant 0 : index
    %2 = vector.load %arg4[%c0_2, %c0_3] : memref<32x32xf32, #tpu.memory_space<vmem>>, vector<32x32xf32>
    %c0_4 = arith.constant 0 : index
    %c0_5 = arith.constant 0 : index
    %3 = vector.load %arg3[%c0_4, %c0_5] : memref<16x32xf32, #tpu.memory_space<vmem>>, vector<16x32xf32>
    %cst = arith.constant dense<0.000000e+00> : vector<64x32xf32>
    %4 = tpu.matmul %1, %3, %cst {dimension_numbers = #tpu.dot_dimension_numbers<[1], [0], [0], [1], [0, 0, 1, 1], [], []>} : vector<64x16xf32>, vector<16x32xf32>, vector<64x32xf32> -> vector<64x32xf32>
    %c0_6 = arith.constant 0 : index
    %c0_7 = arith.constant 0 : index
    %5 = vector.load %arg7[%c0_6, %c0_7] : memref<1x32xf32, #tpu.memory_space<vmem>>, vector<1x32xf32>
    %6 = vector.broadcast %5 : vector<1x32xf32> to vector<64x32xf32>
    %7 = arith.addf %4, %6 : vector<64x32xf32>
    %c0_8 = arith.constant 0 : index
    %c0_9 = arith.constant 0 : index
    %8 = vector.load %arg5[%c0_8, %c0_9] : memref<1x16xf32, #tpu.memory_space<vmem>>, vector<1x16xf32>
    %9 = vector.broadcast %8 : vector<1x16xf32> to vector<64x16xf32>
    %10 = arith.mulf %1, %9 : vector<64x16xf32>
    %cst_10 = arith.constant dense<0.000000e+00> : vector<64xf32>
    %11 = vector.multi_reduction <add>, %10, %cst_10 [1] : vector<64x16xf32> to vector<64xf32>
    %12 = vector.shape_cast %11 : vector<64xf32> to vector<64x1xf32>
    %c0_11 = arith.constant 0 : index
    %c0_12 = arith.constant 0 : index
    %13 = vector.load %arg8[%c0_11, %c0_12] : memref<1x1xf32, #tpu.memory_space<vmem>>, vector<1x1xf32>
    %14 = vector.broadcast %13 : vector<1x1xf32> to vector<64x1xf32>
    %15 = arith.addf %12, %14 : vector<64x1xf32>
    %c0_13 = arith.constant 0 : index
    %c0_14 = arith.constant 0 : index
    %c0_15 = arith.constant 0 : index
    %16 = vector.load %arg2[%c0_13, %c0_14, %c0_15] : memref<1x8x32xf32, #tpu.memory_space<vmem>>, vector<1x8x32xf32>
    %17 = vector.shape_cast %16 : vector<1x8x32xf32> to vector<8x32xf32>
    %18 = vector.extract_strided_slice %7 {offsets = [0, 0], sizes = [32, 32], strides = [1, 1]} : vector<64x32xf32> to vector<32x32xf32>
    %19 = vector.extract_strided_slice %7 {offsets = [32, 0], sizes = [32, 32], strides = [1, 1]} : vector<64x32xf32> to vector<32x32xf32>
    %cst_16 = arith.constant dense<0.000000e+00> : vector<32x32xf32>
    %20 = tpu.matmul %2, %2, %cst_16 {dimension_numbers = #tpu.dot_dimension_numbers<[1], [0], [0], [1], [0, 0, 1, 1], [], []>} : vector<32x32xf32>, vector<32x32xf32>, vector<32x32xf32> -> vector<32x32xf32>
    %cst_17 = arith.constant dense<0.000000e+00> : vector<32x32xf32>
    %21 = tpu.matmul %18, %2, %cst_17 {dimension_numbers = #tpu.dot_dimension_numbers<[1], [0], [0], [1], [0, 0, 1, 1], [], []>} : vector<32x32xf32>, vector<32x32xf32>, vector<32x32xf32> -> vector<32x32xf32>
    %22 = arith.addf %21, %19 : vector<32x32xf32>
    %cst_18 = arith.constant dense<0.000000e+00> : vector<8x32xf32>
    %23 = tpu.matmul %17, %20, %cst_18 {dimension_numbers = #tpu.dot_dimension_numbers<[1], [0], [0], [1], [0, 0, 1, 1], [], []>} : vector<8x32xf32>, vector<32x32xf32>, vector<8x32xf32> -> vector<8x32xf32>
    %24 = vector.extract_strided_slice %22 {offsets = [0, 0], sizes = [8, 32], strides = [1, 1]} : vector<32x32xf32> to vector<8x32xf32>
    %25 = arith.addf %23, %24 : vector<8x32xf32>
    %cst_19 = arith.constant dense<0.000000e+00> : vector<8x32xf32>
    %26 = tpu.matmul %25, %20, %cst_19 {dimension_numbers = #tpu.dot_dimension_numbers<[1], [0], [0], [1], [0, 0, 1, 1], [], []>} : vector<8x32xf32>, vector<32x32xf32>, vector<8x32xf32> -> vector<8x32xf32>
    %27 = vector.extract_strided_slice %22 {offsets = [8, 0], sizes = [8, 32], strides = [1, 1]} : vector<32x32xf32> to vector<8x32xf32>
    %28 = arith.addf %26, %27 : vector<8x32xf32>
    %cst_20 = arith.constant dense<0.000000e+00> : vector<8x32xf32>
    %29 = tpu.matmul %28, %20, %cst_20 {dimension_numbers = #tpu.dot_dimension_numbers<[1], [0], [0], [1], [0, 0, 1, 1], [], []>} : vector<8x32xf32>, vector<32x32xf32>, vector<8x32xf32> -> vector<8x32xf32>
    %30 = vector.extract_strided_slice %22 {offsets = [16, 0], sizes = [8, 32], strides = [1, 1]} : vector<32x32xf32> to vector<8x32xf32>
    %31 = arith.addf %29, %30 : vector<8x32xf32>
    %cst_21 = arith.constant dense<0.000000e+00> : vector<8x32xf32>
    %32 = tpu.matmul %31, %20, %cst_21 {dimension_numbers = #tpu.dot_dimension_numbers<[1], [0], [0], [1], [0, 0, 1, 1], [], []>} : vector<8x32xf32>, vector<32x32xf32>, vector<8x32xf32> -> vector<8x32xf32>
    %33 = vector.extract_strided_slice %22 {offsets = [24, 0], sizes = [8, 32], strides = [1, 1]} : vector<32x32xf32> to vector<8x32xf32>
    %34 = arith.addf %32, %33 : vector<8x32xf32>
    %c0_22 = arith.constant 0 : index
    %c0_23 = arith.constant 0 : index
    %c0_24 = arith.constant 0 : index
    %35 = vector.load %arg10[%c0_22, %c0_23, %c0_24] : memref<1x8x32xf32, #tpu.memory_space<vmem>>, vector<1x8x32xf32>
    %36 = vector.shape_cast %35 : vector<1x8x32xf32> to vector<8x32xf32>
    %37 = vector.shape_cast %34 : vector<8x32xf32> to vector<1x8x32xf32>
    tpu.vector_store %arg10[%c0_22, %c0_23, %c0_24], %37 {strides = array<i32>} : memref<1x8x32xf32, #tpu.memory_space<vmem>>, vector<1x8x32xf32>,
    %38 = tpu.concatenate %17, %25, %28, %31 in 0 : vector<8x32xf32>, vector<8x32xf32>, vector<8x32xf32>, vector<8x32xf32> -> vector<32x32xf32>
    %cst_25 = arith.constant dense<0.000000e+00> : vector<32x32xf32>
    %39 = tpu.matmul %38, %2, %cst_25 {dimension_numbers = #tpu.dot_dimension_numbers<[1], [0], [0], [1], [0, 0, 1, 1], [], []>} : vector<32x32xf32>, vector<32x32xf32>, vector<32x32xf32> -> vector<32x32xf32>
    %40 = arith.addf %18, %39 : vector<32x32xf32>
    %41 = tpu.concatenate %38, %40 in 0 : vector<32x32xf32>, vector<32x32xf32> -> vector<64x32xf32>
    %c0_26 = arith.constant 0 : index
    %c0_27 = arith.constant 0 : index
    %42 = vector.load %arg6[%c0_26, %c0_27] : memref<1x32xf32, #tpu.memory_space<vmem>>, vector<1x32xf32>
    %43 = vector.broadcast %42 : vector<1x32xf32> to vector<64x32xf32>
    %44 = arith.mulf %41, %43 : vector<64x32xf32>
    %cst_28 = arith.constant dense<0.000000e+00> : vector<64xf32>
    %45 = vector.multi_reduction <add>, %44, %cst_28 [1] : vector<64x32xf32> to vector<64xf32>
    %46 = vector.shape_cast %45 : vector<64xf32> to vector<64x1xf32>
    %47 = arith.addf %15, %46 : vector<64x1xf32>
    %48 = arith.negf %47 : vector<64x1xf32>
    %49 = math.exp %48 : vector<64x1xf32>
    %cst_29 = arith.constant 1.000000e+00 : f32
    %50 = vector.broadcast %cst_29 : f32 to vector<64x1xf32>
    %51 = arith.addf %50, %49 : vector<64x1xf32>
    %52 = arith.divf %50, %51 : vector<64x1xf32>
    %c0_30 = arith.constant 0 : index
    %c0_31 = arith.constant 0 : index
    %c0_32 = arith.constant 0 : index
    %53 = vector.load %arg9[%c0_30, %c0_31, %c0_32] : memref<1x64x1xf32, #tpu.memory_space<vmem>>, vector<1x64x1xf32>
    %54 = vector.shape_cast %53 : vector<1x64x1xf32> to vector<64x1xf32>
    %55 = vector.shape_cast %52 : vector<64x1xf32> to vector<1x64x1xf32>
    tpu.vector_store %arg9[%c0_30, %c0_31, %c0_32], %55 {strides = array<i32>} : memref<1x64x1xf32, #tpu.memory_space<vmem>>, vector<1x64x1xf32>,
    return
  }
  func.func @transform_0(%arg0: i32) -> (i32, i32, i32) {
    %c0_i32 = arith.constant 0 : i32
    %c0_i32_0 = arith.constant 0 : i32
    %c0_i32_1 = arith.constant 0 : i32
    return %arg0, %c0_i32, %c0_i32_0 : i32, i32, i32
  }
  func.func @transform_1(%arg0: i32) -> (i32, i32, i32) {
    %c0_i32 = arith.constant 0 : i32
    %c0_i32_0 = arith.constant 0 : i32
    %c0_i32_1 = arith.constant 0 : i32
    return %arg0, %c0_i32, %c0_i32_0 : i32, i32, i32
  }
  func.func @transform_2(%arg0: i32) -> (i32, i32) {
    %c0_i32 = arith.constant 0 : i32
    %c0_i32_0 = arith.constant 0 : i32
    %c0_i32_1 = arith.constant 0 : i32
    return %c0_i32, %c0_i32_0 : i32, i32
  }
  func.func @transform_3(%arg0: i32) -> (i32, i32) {
    %c0_i32 = arith.constant 0 : i32
    %c0_i32_0 = arith.constant 0 : i32
    %c0_i32_1 = arith.constant 0 : i32
    return %c0_i32, %c0_i32_0 : i32, i32
  }
  func.func @transform_4(%arg0: i32) -> (i32, i32) {
    %c0_i32 = arith.constant 0 : i32
    %c0_i32_0 = arith.constant 0 : i32
    %c0_i32_1 = arith.constant 0 : i32
    return %c0_i32, %c0_i32_0 : i32, i32
  }
  func.func @transform_5(%arg0: i32) -> (i32, i32) {
    %c0_i32 = arith.constant 0 : i32
    %c0_i32_0 = arith.constant 0 : i32
    %c0_i32_1 = arith.constant 0 : i32
    return %c0_i32, %c0_i32_0 : i32, i32
  }
  func.func @transform_6(%arg0: i32) -> (i32, i32) {
    %c0_i32 = arith.constant 0 : i32
    %c0_i32_0 = arith.constant 0 : i32
    %c0_i32_1 = arith.constant 0 : i32
    return %c0_i32, %c0_i32_0 : i32, i32
  }
  func.func @transform_7(%arg0: i32) -> (i32, i32) {
    %c0_i32 = arith.constant 0 : i32
    %c0_i32_0 = arith.constant 0 : i32
    %c0_i32_1 = arith.constant 0 : i32
    return %c0_i32, %c0_i32_0 : i32, i32
  }
  func.func @transform_8(%arg0: i32) -> (i32, i32, i32) {
    %c0_i32 = arith.constant 0 : i32
    %c0_i32_0 = arith.constant 0 : i32
    %c0_i32_1 = arith.constant 0 : i32
    return %arg0, %c0_i32, %c0_i32_0 : i32, i32, i32
  }
  func.func @transform_9(%arg0: i32) -> (i32, i32, i32) {
    %c0_i32 = arith.constant 0 : i32
    %c0_i32_0 = arith.constant 0 : i32
    %c0_i32_1 = arith.constant 0 : i32
    return %arg0, %c0_i32, %c0_i32_0 : i32, i32, i32
  }
}

</mosaic_0001>

<bundles_post_ra>
// kernel: tpu_custom_call.1
= control target key start
LH: loop header
LB: loop body
LE: loop exit
PB: predicated region body
PF: predicated region fallthrough
CT: control target
= control target key end

     0   :  { %s2133_s0 = inlined_call_operand.vmem [shape: f32[2,64,16], index: 0, kind: input, shape index: {}]   ;;  %s2134_s1 = inlined_call_operand.vmem [shape: f32[2,8,32], index: 1, kind: input, shape index: {}]   ;;  %s2135_s2 = inlined_call_operand.vmem [shape: f32[16,32], index: 2, kind: input, shape index: {}]   ;;  %s2136_s3 = inlined_call_operand.vmem [shape: f32[32,32], index: 3, kind: input, shape index: {}]   ;;  %s2137_s4 = inlined_call_operand.vmem [shape: f32[1,16], index: 4, kind: input, shape index: {}]   ;;  %s2138_s5 = inlined_call_operand.vmem [shape: f32[1,32], index: 5, kind: input, shape index: {}]   ;;  %s2139_s6 = inlined_call_operand.vmem [shape: f32[1,32], index: 6, kind: input, shape index: {}]   ;;  %s2140_s7 = inlined_call_operand.<no memory space> [shape: f32[1,1], index: 7, kind: input, shape index: {}]   ;;  %s2141_s8 = inlined_call_operand.vmem [shape: f32[2,64,1], index: 8, kind: output, shape index: {0}]   ;;  %s2142_s9 = inlined_call_operand.hbm [shape: f32[2,8,32], index: 9, kind: output, shape index: {1}]  }
   0x1   :  { %v15_v0 = vstv %s2140_s7 }
   0x2   :  { %16 = vst [vmem:[#allocation2] sm:$0x1] %v15_v0 }
   0x3   :  { %17 = vsyncpa [#allocation4], 0 }
   0x4   :  { %19 = vsyncpa [#allocation4 + $0x1], 0  ;;  %s1771_s11 = smov 0   ;;  %s1773_s12 = smov 0  }
   0x5   :  { %s1775_s13 = smov 0   ;;  %s1777_s14 = smov 0  }
   0x6 LB: > { %s1792_s7 = sadd.s32 4294967295, %s1713_s14   ;;  %s1368_s15 = sadd.s32 4294967294, %s1713_s14   ;;  %s1713_s14 = sphi %s1777_s14, %s2148_s14   ;;  %s1709_s13 = sphi %s1775_s13, %s2147_s13   ;;  %s1705_s12 = sphi %s1773_s12, %s2146_s12   ;;  %s1701_s11 = sphi %s1771_s11, %s2145_s11  }
   0x7   : > { %s1796_s16 = sadd.s32 1, %s1713_s14   ;;  %s236_s17 = sadd.s32 1, %s1709_s13 }
   0x8   : > { %s233_s18 = ssub.s32 %s1713_s14, %s1796_s16  ;;  %p246_p0 = scmp.ne.s32.totalorder %s1709_s13, %s1705_s12 }
   0x9   : > { %p234_p1 = scmp.eq.s32.totalorder %s233_s18, 0  ;;  %p247_p2 = scmp.eq.s32.totalorder %s1792_s7, 1 }
   0xa   : > { %p252_p3 = scmp.ne.s32.totalorder %s1705_s12, %s1701_s11  ;;  %p253_p4 = scmp.eq.s32.totalorder %s1368_s15, 1 }
   0xb   : > { %s1807_s19 = scalar_select %p234_p1, %s1709_s13, %s236_s17  }
   0xc   : > { %p1809_p5 = por %p247_p2, %p246_p0  ;;  %p1813_p6 = por %p253_p4, %p252_p3 }
   0xd   : > { %p1371_p7 = scmp.ge.s32.totalorder %s1713_s14, 1  ;;  %p304_p8 = scmp.lt.s32.totalorder %s1713_s14, 3 }
   0xf   : > { %p305_p9 = pnand %p1371_p7, %p304_p8 }
  0x10   : > { %p349_p10 = scmp.lt.s32.totalorder (!%p305_p9), %s1792_s7, 1  ;;  %s1415_s10 = sshll.u32 (!%p305_p9), %s1792_s7, 7 }
  0x11   : > { %308 = sbr.rel (%p305_p9) target bundleno = 1199 (0x4af), region = 52  ;;  %s1270_s22 = scalar_lea.hbm (!%p305_p9), %s2142_s9, %s1415_s10 }
  0x12   : > { %s1717_s25 = smov (!%p305_p9), [#allocation3]  }
  0x13   : > { %s1657_s27 = sshll.u32 (!%p305_p9), %s1717_s25, 4  ;;  %s1658_s27 = int_to_ptr.vmem [resolvable:$false] %s1657_s27 }
  0x16   : > { %v376_v1 = vld [vmem:[%s2135_s2 + $0x8] sm:$0xff]  ;;  %v375_v2 = vld [vmem:[%s2135_s2] sm:$0xff]  ;;  %s1827_s26 = scalar_select %p349_p10, %s1792_s7, 1  ;;  %v1832_v3 = vld [vmem:[%s2136_s3 + $0x18] sm:$0xff]  ;;  %vm384_vm0 = vcmask 130048   ;;  %vm569_vm1 = vcmask 261120  }
  0x17   : > { %1474 = vmatprep.subr.mxu0 %v376_v1  ;;  %1576 = vmatprep.subr.mxu1 %v376_v1  ;;  %v1844_v4 = vld [vmem:[%s2136_s3 + $0x10] sm:$0xff]  ;;  %v1879_v13 = vld [vmem:[%s2136_s3 + $0x8] sm:$0xff]  ;;  %v1884_v14 = vld [vmem:[%s2136_s3] sm:$0xff]  ;;  %v1715_v15 = vmov 0.0   ;;  %vm1716_vm2 = vmmov 0   ;;  %vm1241_vm3 = vcmask 7168  }
  0x18   : > { %1475 = vmatpush3.msra.mxu0 %v376_v1  ;;  %1578 = vmatpush3.msra.mxu1 %v376_v1  ;;  %s1418_s29 = sshll.u32 %s1827_s26, 6  ;;  %v1378_v16 = vld [vmem:[%s2139_s6] ss:$0 sm:$0xff]  ;;  %s1375_s30 = sshll.u32 %s1827_s26, 3 }
  0x19   : > { %1476 = vmatprep.subr.mxu0 %v375_v2  ;;  %1577 = vmatprep.subr.mxu1 %v375_v2  ;;  %s353_s15 = scalar_lea.vmem %s2133_s0, %s1418_s29  ;;  %s357_s17 = scalar_lea.vmem %s2134_s1, %s1375_s30  ;;  %v1387_v38 = vld [vmem:[%s2137_s4] ss:$0 sm:$0xff] }
  0x1a   : > { %1477 = vmatpush3.msra.mxu0 %v375_v2  ;;  %1579 = vmatpush3.msra.mxu1 %v375_v2  ;;  %v1846_v5 = vld [vmem:[%s353_s15] sm:$0xff]  ;;  %v1850_v7 = vld [vmem:[%s353_s15 + $0x8] sm:$0xff]  ;;  %v1858_v9 = vld [vmem:[%s353_s15 + $0x10] sm:$0xff]  ;;  %s2032_s28 = scalar_lea.vmem %s2141_s8, %s1418_s29  ;;  %s346_s26 = sand.u32 1, %s1705_s12  }
  0x1b   : > { %1490 = vmatprep.subr.mxu1 %v1832_v3  ;;  %v1848_v6 = vld [vmem:[%s353_s15 + $0x20] sm:$0xff]  ;;  %1478 = vmatprep.mubr.msk.f32.mxu0 %vm384_vm0, %v1846_v5  ;;  %v1856_v8 = vld [vmem:[%s353_s15 + $0x28] sm:$0xff]  ;;  %v1860_v10 = vld [vmem:[%s353_s15 + $0x30] sm:$0xff]  ;;  %v523_v39 = vmul.f32 %v1387_v38, %v1858_v9  ;;  %v521_v40 = vmul.f32 %v1387_v38, %v1846_v5  ;;  %v522_v49 = vmul.f32 %v1387_v38, %v1850_v7  ;;  %s1372_s29 = sshll.u32 %s346_s26, 3  ;;  %s1256_s23 = scalar_lea.sflag [#allocation4], %s346_s26 }
  0x1c   : > { %1484 = vmatprep.mubr.msk.f32.mxu1 %vm384_vm0, %v1848_v6  ;;  %1479 = vmatmul.mubr.msk.f32.vlgmr.msra.gmra.mxu0 %vm384_vm0, %v1850_v7  ;;  %v1869_v11 = vld [vmem:[%s353_s15 + $0x18] sm:$0xff]  ;;  %v1958_v37 = vld [vmem:[%s357_s17] sm:$0xff]  ;;  %v526_v43 = vmul.f32 %v1387_v38, %v1856_v8  ;;  %v525_v63 = vmul.f32 %v1387_v38, %v1848_v6  ;;  %v527_v1 = vmul.f32 %v1387_v38, %v1860_v10  ;;  %s348_s30 = scalar_lea.vmem [#allocation3], %s1372_s29  ;;  %s1659_s29 = scalar_lea.vmem %s1658_s27, 256 }
  0x1d   : > { %1485 = vmatmul.mubr.msk.f32.vlgmr.msra.gmra.mxu1 %vm384_vm0, %v1856_v8  ;;  %1481 = vmatprep.mubr.msk.f32.mxu0 %vm384_vm0, %v1858_v9  ;;  %v1871_v12 = vld [vmem:[%s353_s15 + $0x38] sm:$0xff]  ;;  %v535_v41 = vsel %vm384_vm0, %v523_v39, 0.0  ;;  %v524_v42 = vmul.f32 %v1387_v38, %v1869_v11  ;;  %v529_v44 = vsel %vm384_vm0, %v521_v40, 0.0  ;;  %v532_v50 = vsel %vm384_vm0, %v522_v49, 0.0  ;;  %v1999_v58 = vld [vmem:[%s2138_s5] ss:$0 sm:$0xff] }
  0x1e   : > { %1491 = vmatpush3.msra.mxu1 %v1832_v3  ;;  %1487 = vmatprep.mubr.msk.f32.mxu1 %vm384_vm0, %v1860_v10  ;;  %v544_v46 = vsel %vm384_vm0, %v526_v43, 0.0  ;;  %v528_v47 = vmul.f32 %v1387_v38, %v1871_v12  ;;  %v541_v0 = vsel %vm384_vm0, %v525_v63, 0.0  ;;  %v547_v2 = vsel %vm384_vm0, %v527_v1, 0.0  ;;  %s1272_s15 = sshll.u32 %s348_s30, 4  ;;  %s1273_s15 = int_to_ptr.vmem [resolvable:$true] %s1272_s15 }
  0x1f   : > { %1492 = vmatprep.subr.mxu1 %v1844_v4  ;;  %1518 = vmatprep.subr.mxu0 %v1715_v15  ;;  %v538_v45 = vsel %vm384_vm0, %v524_v42, 0.0  ;;  %v1153_v5 = vmul.f32 %v1999_v58, %v1958_v37  ;;  %s1653_s24 = scalar_lea.vmem %s1273_s15, 128  ;;  %p1660_p0 = scmp.lt.s32.totalorder %s1273_s15, %s1658_s27 }
  0x20   : > { %1493 = vmatpush3.msra.mxu1 %v1844_v4  ;;  %1482 = vmatmul.mubr.msk.f32.gmra.mxu0 %vm384_vm0, %v1869_v11  ;;  %v550_v48 = vsel %vm384_vm0, %v528_v47, 0.0  ;;  %p1654_p11 = scmp.ne.s32.totalorder %s1273_s15, %s1653_s24  ;;  %p1661_p1 = scmp.lt.s32.totalorder %s1659_s29, %s1653_s24 }
  0x21   : > { %1488 = vmatmul.mubr.msk.f32.gmra.mxu1 %vm384_vm0, %v1871_v12  ;;  %1494 = vmatprep.subr.mxu1 %v1879_v13  ;;  %v1161_v7 = vsel %vm569_vm1, %v1153_v5, 0.0  ;;  %v2022_v12 = vld [vmem:[#allocation2] ss:$0 sm:$0xff] }
  0x22   : > { %1498 = vmatprep.mubr.msk.f32.mxu1 %vm569_vm1, %v1884_v14  ;;  %1495 = vmatpush3.msra.mxu1 %v1879_v13  ;;  %p1655_p12 = pnand %p1654_p11, %p1809_p5  ;;  %p1662_p2 = por %p1661_p1, %p1660_p0 }
  0x23   : > { %1496 = vmatprep.subr.mxu1 %v1884_v14  ;;  %1526 = vmatprep.mubr.msk.f32.mxu0 %vm1716_vm2, %v1715_v15 }
  0x24   : > { %1497 = vmatpush3.msra.mxu1 %v1884_v14  ;;  %536 = vadd.xlane.f32.xlu1 %v535_v41  ;;  %p1656_p13 = pneg %p1655_p12 }
  0x25   : > { %1499 = vmatmul.mubr.msk.f32.vlgmr.msra.gmra.mxu1 %vm569_vm1, %v1879_v13  ;;  %1504 = vmatprep.subr.mxu1 %v1832_v3 }
  0x26   : > { %1501 = vmatprep.mubr.msk.f32.mxu1 %vm569_vm1, %v1844_v4  ;;  %1505 = vmatpush3.msra.mxu1 %v1832_v3  ;;  %p1663_p3 = pnand %p1662_p2, %p1656_p13 }
  0x27   : > { %1506 = vmatprep.subr.mxu1 %v1844_v4  ;;  %530 = vadd.xlane.f32.xlu0 %v529_v44 }
  0x28   : > { %1507 = vmatpush3.msra.mxu1 %v1844_v4  ;;  %539 = vadd.xlane.f32.xlu1 %v538_v45 }
  0x29   : > { %1502 = vmatmul.mubr.msk.f32.gmra.mxu1 %vm569_vm1, %v1832_v3  ;;  %1508 = vmatprep.subr.mxu1 %v1879_v13 }
  0x2a   : > { %1509 = vmatpush3.msra.mxu1 %v1879_v13 }
  0x2b   : > { %1510 = vmatprep.subr.mxu1 %v1884_v14  ;;  %533 = vadd.xlane.f32.xlu0 %v532_v50 }
  0x2c   : > { %1511 = vmatpush3.msra.mxu1 %v1884_v14  ;;  %545 = vadd.xlane.f32.xlu1 %v544_v46 }
  0x2d   : > { %1529 = vmatprep.subr.mxu1 %v1715_v15 }
  0x2f   : > { %542 = vadd.xlane.f32.xlu0 %v541_v0 }
  0x30   : > { %551 = vadd.xlane.f32.xlu1 %v550_v48 }
  0x33   : > { %548 = vadd.xlane.f32.xlu0 %v547_v2 }
  0x37   : > { %1162 = vadd.xlane.f32.xlu0 %v1161_v7 }
  0xad   : > { %v537_v8 = vpop.xlane.xlu1 %536 }
  0xb0   : > { %v531_v6 = vpop.xlane.xlu0 %530 }
  0xb1   : > { %v2018_v9 = vpop.xlane.xlu1 %539 }
  0xb5   : > { %v2020_v11 = vpop.xlane.xlu1 %545 }
  0xb9   : > { %v2024_v10 = vpop.xlane.xlu1 %551 }
  0xdc   : > { %v1480_v17 = vpop.f32.mrf.mxu0 }
  0xdd   : > { %v1486_v18 = vpop.f32.mrf.mxu1  ;;  %v1920_v20 = vadd.f32 %v1480_v17, %v1378_v16 }
  0xde   : > { %v1918_v19 = vadd.f32 %v1486_v18, %v1378_v16  ;;  %v475_v21 = vpop.f32.mrf.mxu0 }
  0xdf   : > { %v495_v22 = vpop.f32.mrf.mxu1  ;;  %v1922_v23 = vadd.f32 %v1378_v16, %v475_v21 }
  0xe0   : > { %v1924_v24 = vadd.f32 %v1378_v16, %v495_v22  ;;  %v1483_v25 = vpop.f32.mrf.mxu0 }
  0xe1   : > { %v1489_v26 = vpop.f32.mrf.mxu1  ;;  %1512 = vmatprep.mubr.msk.f32.mxu1 %vm569_vm1, %v1922_v23  ;;  %v1930_v28 = vadd.f32 %v1483_v25, %v1378_v16 }
  0xe2   : > { %v1926_v27 = vadd.f32 %v1489_v26, %v1378_v16  ;;  %v485_v29 = vpop.f32.mrf.mxu0  ;;  %1513 = vmatmul.mubr.msk.f32.vlgmr.msra.gmra.mxu1 %vm569_vm1, %v1920_v20 }
  0xe3   : > { %v505_v30 = vpop.f32.mrf.mxu1  ;;  %v1934_v31 = vadd.f32 %v1378_v16, %v485_v29 }
  0xe4   : > { %v1936_v32 = vadd.f32 %v1378_v16, %v505_v30 }
  0xe5   : > { %v1938_v33 = vpop.f32.mrf.mxu1  ;;  %1515 = vmatprep.mubr.msk.f32.mxu1 %vm569_vm1, %v1934_v31 }
  0xe6   : > { %1516 = vmatmul.mubr.msk.f32.gmra.mxu1 %vm569_vm1, %v1930_v28 }
  0xe7   : > { %v1944_v34 = vpop.f32.mrf.mxu1  ;;  %1537 = vmatprep.mubr.msk.f32.mxu1 %vm1716_vm2, %v1715_v15 }
  0xe9   : > { %v1503_v35 = vpop.f32.mrf.mxu1 }
  0xea   : > { %1519 = vmatpush3.msra.mxu0 %v1503_v35  ;;  %1530 = vmatpush3.msra.mxu1 %v1503_v35 }
  0xeb   : > { %v658_v36 = vpop.f32.mrf.mxu1  ;;  %1520 = vmatprep.subr.mxu0 %v1715_v15  ;;  %1531 = vmatprep.subr.mxu1 %v1715_v15 }
  0xec   : > { %1521 = vmatpush3.msra.mxu0 %v658_v36  ;;  %1532 = vmatpush3.msra.mxu1 %v658_v36 }
  0xed   : > { %1522 = vmatprep.subr.mxu0 %v1715_v15  ;;  %1533 = vmatprep.subr.mxu1 %v1715_v15 }
  0xee   : > { %1523 = vmatpush3.msra.mxu0 %v1938_v33  ;;  %1534 = vmatpush3.msra.mxu1 %v1938_v33 }
  0xef   : > { %1524 = vmatprep.subr.mxu0 %v1715_v15  ;;  %1535 = vmatprep.subr.mxu1 %v1715_v15 }
  0xf0   : > { %1525 = vmatpush3.msra.mxu0 %v1944_v34  ;;  %1536 = vmatpush3.msra.mxu1 %v1944_v34 }
  0xf1   : > { %1527 = vmatmul.mubr.msk.f32.vlgmr.msra.gmra.mxu0 %vm569_vm1, %v1958_v37  ;;  %1540 = vmatprep.subr.mxu0 %v1715_v15 }
  0xf2   : > { %1541 = vmatpush3.msra.mxu0 %v1503_v35  ;;  %1551 = vmatprep.subr.mxu1 %v1715_v15 }
  0xf3   : > { %1542 = vmatprep.subr.mxu0 %v1715_v15  ;;  %1548 = vmatprep.mubr.msk.f32.mxu0 %vm1716_vm2, %v1715_v15 }
  0xf4   : > { %1543 = vmatpush3.msra.mxu0 %v658_v36 }
  0xf5   : > { %1544 = vmatprep.subr.mxu0 %v1715_v15 }
  0xf6   : > { %1545 = vmatpush3.msra.mxu0 %v1938_v33 }
  0xf7   : > { %1546 = vmatprep.subr.mxu0 %v1715_v15 }
  0xf8   : > { %1547 = vmatpush3.msra.mxu0 %v1944_v34 }
  0xf9   : > { %1562 = vmatprep.subr.mxu0 %v1832_v3 }
 0x1a2   : > { %v1514_v51 = vpop.f32.mrf.mxu1 }
 0x1a3   : > { %v751_v52 = vadd.f32 %v1514_v51, %v1918_v19 }
 0x1a4   : > { %v745_v53 = vpop.f32.mrf.mxu1 }
 0x1a5   : > { %v746_v56 = vadd.f32 %v745_v53, %v1924_v24 }
 0x1a6   : > { %v1517_v54 = vpop.f32.mrf.mxu1 }
 0x1a7   : > { %v1993_v55 = vadd.f32 %v1517_v54, %v1926_v27 }
 0x1a8   : > { %v755_v25 = vpop.f32.mrf.mxu1 }
 0x1a9   : > { %v756_v46 = vadd.f32 %v755_v25, %v1936_v32 }
 0x1b1   : > { %v833_v57 = vpop.f32.mrf.mxu0 }
 0x1b2   : > { %v834_v59 = vadd.f32 %v833_v57, %v746_v56 }
 0x1b3   : > { %v1528_v60 = vpop.f32.mrf.mxu0 }
 0x1b4   : > { %1538 = vmatmul.mubr.msk.f32.vlgmr.msra.gmra.mxu1 %vm569_vm1, %v834_v59  ;;  %v1154_v61 = vmul.f32 %v1999_v58, %v834_v59 }
 0x1b5   : > { %1552 = vmatpush3.msra.mxu1 %v1503_v35  ;;  %1559 = vmatprep.mubr.msk.f32.mxu1 %vm1716_vm2, %v1715_v15 }
 0x1b6   : > { %1553 = vmatprep.subr.mxu1 %v1715_v15  ;;  %v1164_v62 = vsel %vm569_vm1, %v1154_v61, 0.0  ;;  %v563_v61 = vadd.f32 %v2022_v12, %v2018_v9 }
 0x1b7   : > { %1554 = vmatpush3.msra.mxu1 %v658_v36  ;;  %1165 = vadd.xlane.f32.xlu1 %v1164_v62  ;;  %v560_v36 = vadd.f32 %v2022_v12, %v531_v6 }
 0x1b8   : > { %1555 = vmatprep.subr.mxu1 %v1715_v15 }
 0x1b9   : > { %1556 = vmatpush3.msra.mxu1 %v1938_v33 }
 0x1ba   : > { %1557 = vmatprep.subr.mxu1 %v1715_v15  ;;  %v534_v15 = vpop.xlane.xlu0 %533 }
 0x1bb   : > { %1558 = vmatpush3.msra.mxu1 %v1944_v34  ;;  %v561_v16 = vadd.f32 %v2022_v12, %v534_v15 }
 0x1be   : > { %v2036_v27 = vpop.xlane.xlu0 %542 }
 0x1c2   : > { %v2046_v35 = vpop.xlane.xlu0 %548 }
 0x240   : > { %v1166_v17 = vpop.xlane.xlu1 %1165 }
 0x241   : > { %v1186_v18 = vadd.f32 %v1166_v17, %v561_v16 }
 0x243   : > { %v1407_v19 = vmul.f32 -1.442695, %v1186_v18 }
 0x245   : > { %1621 = vpow2.f32 %v1407_v19 }
 0x252   : > { %v1622_v21 = vpop.eup %1621 }
 0x253   : > { %v1218_v22 = vadd.f32 1.0, %v1622_v21 }
 0x255   : > { %1623 = vrcp.f32 %v1218_v22 }
 0x262   : > { %v1624_v24 = vpop.eup %1623 }
 0x263   : > { %1243 = vst.msk [vmem:[%s2032_s28 + $0x8] sm:$0xff] %vm1241_vm3, %v1624_v24 }
 0x274   : > { %v906_v26 = vpop.f32.mrf.mxu1 }
 0x275   : > { %v907_v29 = vadd.f32 %v906_v26, %v751_v52 }
 0x276   : > { %v1539_v30 = vpop.f32.mrf.mxu1 }
 0x277   : > { %1549 = vmatmul.mubr.msk.f32.vlgmr.msra.gmra.mxu0 %vm569_vm1, %v907_v29  ;;  %v1155_v33 = vmul.f32 %v1999_v58, %v907_v29 }
 0x278   : > { %1563 = vmatpush3.msra.mxu0 %v1832_v3  ;;  %1570 = vmatprep.mubr.msk.f32.mxu0 %vm569_vm1, %v1958_v37  ;;  %v1163_v3 = vpop.xlane.xlu0 %1162 }
 0x279   : > { %1564 = vmatprep.subr.mxu0 %v1844_v4  ;;  %v1167_v34 = vsel %vm569_vm1, %v1155_v33, 0.0 }
 0x27a   : > { %1565 = vmatpush3.msra.mxu0 %v1844_v4  ;;  %1168 = vadd.xlane.f32.xlu0 %v1167_v34  ;;  %v1185_v4 = vadd.f32 %v1163_v3, %v560_v36 }
 0x27b   : > { %1566 = vmatprep.subr.mxu0 %v1879_v13 }
 0x27c   : > { %1567 = vmatpush3.msra.mxu0 %v1879_v13  ;;  %v1406_v37 = vmul.f32 -1.442695, %v1185_v4  ;;  %v562_v13 = vadd.f32 %v2022_v12, %v537_v8 }
 0x27d   : > { %1568 = vmatprep.subr.mxu0 %v1884_v14 }
 0x27e   : > { %1569 = vmatpush3.msra.mxu0 %v1884_v14  ;;  %1625 = vpow2.f32 %v1406_v37 }
 0x27f   : > { %1571 = vmatmul.mubr.msk.f32.vlgmr.msra.gmra.mxu0 %vm569_vm1, %v834_v59 }
 0x280   : > { %1573 = vmatprep.mubr.msk.f32.mxu0 %vm569_vm1, %v907_v29 }
 0x28b   : > { %v1626_v38 = vpop.eup %1625 }
 0x28c   : > { %v1217_v39 = vadd.f32 1.0, %v1626_v38 }
 0x28e   : > { %1627 = vrcp.f32 %v1217_v39 }
 0x29b   : > { %v1628_v40 = vpop.eup %1627 }
 0x29c   : > { %1242 = vst.msk [vmem:[%s2032_s28] sm:$0xff] %vm1241_vm3, %v1628_v40 }
 0x303   : > { %v1169_v41 = vpop.xlane.xlu0 %1168 }
 0x304   : > { %v1187_v42 = vadd.f32 %v1169_v41, %v562_v13 }
 0x306   : > { %v1408_v14 = vmul.f32 -1.442695, %v1187_v42 }
 0x308   : > { %1629 = vpow2.f32 %v1408_v14 }
 0x315   : > { %v1630_v43 = vpop.eup %1629 }
 0x316   : > { %v1219_v44 = vadd.f32 1.0, %v1630_v43 }
 0x318   : > { %1631 = vrcp.f32 %v1219_v44 }
 0x325   : > { %v1632_v45 = vpop.eup %1631 }
 0x326   : > { %1244 = vst.msk [vmem:[%s2032_s28 + $0x10] sm:$0xff] %vm1241_vm3, %v1632_v45 }
 0x337   : > { %v979_v47 = vpop.f32.mrf.mxu0 }
 0x338   : > { %v980_v48 = vadd.f32 %v979_v47, %v756_v46 }
 0x339   : > { %v1550_v49 = vpop.f32.mrf.mxu0 }
 0x33a   : > { %1560 = vmatmul.mubr.msk.f32.vlgmr.msra.gmra.mxu1 %vm569_vm1, %v980_v48  ;;  %1574 = vmatmul.mubr.msk.f32.gmra.mxu0 %vm569_vm1, %v980_v48  ;;  %v1156_v50 = vmul.f32 %v1999_v58, %v980_v48 }
 0x33c   : > { %v1170_v51 = vsel %vm569_vm1, %v1156_v50, 0.0 }
 0x33d   : > { %1171 = vadd.xlane.f32.xlu1 %v1170_v51 }
 0x33f   : > { %v1572_v52 = vpop.f32.mrf.mxu0 }
 0x340   : > { %v1143_v53 = vadd.f32 %v1572_v52, %v1920_v20  ;;  %v565_v20 = vadd.f32 %v2022_v12, %v2020_v11 }
 0x341   : > { %v1123_v54 = vpop.f32.mrf.mxu0 }
 0x342   : > { %v1142_v56 = vadd.f32 %v1123_v54, %v1922_v23  ;;  %v1158_v32 = vmul.f32 %v1999_v58, %v1143_v53  ;;  %v564_v23 = vadd.f32 %v2022_v12, %v2036_v27 }
 0x344   : > { %v1176_v57 = vsel %vm569_vm1, %v1158_v32, 0.0  ;;  %v1157_v59 = vmul.f32 %v1999_v58, %v1142_v56 }
 0x345   : > { %1177 = vadd.xlane.f32.xlu1 %v1176_v57 }
 0x346   : > { %v1173_v60 = vsel %vm569_vm1, %v1157_v59, 0.0 }
 0x347   : > { %1174 = vadd.xlane.f32.xlu0 %v1173_v60 }
 0x3c6   : > { %v1172_v62 = vpop.xlane.xlu1 %1171 }
 0x3c7   : > { %v1188_v63 = vadd.f32 %v1172_v62, %v563_v61 }
 0x3c9   : > { %v1409_v0 = vmul.f32 -1.442695, %v1188_v63 }
 0x3cb   : > { %1633 = vpow2.f32 %v1409_v0 }
 0x3ce   : > { %v1178_v1 = vpop.xlane.xlu1 %1177 }
 0x3cf   : > { %v1190_v2 = vadd.f32 %v1178_v1, %v565_v20 }
 0x3d0   : > { %v1175_v5 = vpop.xlane.xlu0 %1174 }
 0x3d1   : > { %v1411_v7 = vmul.f32 -1.442695, %v1190_v2  ;;  %v1189_v8 = vadd.f32 %v1175_v5, %v564_v23 }
 0x3d3   : > { %1635 = vpow2.f32 %v1411_v7  ;;  %v1410_v6 = vmul.f32 -1.442695, %v1189_v8 }
 0x3d5   : > { %1637 = vpow2.f32 %v1410_v6 }
 0x3d8   : > { %v1634_v9 = vpop.eup %1633 }
 0x3d9   : > { %v1220_v15 = vadd.f32 1.0, %v1634_v9 }
 0x3db   : > { %1639 = vrcp.f32 %v1220_v15 }
 0x3e0   : > { %v1636_v11 = vpop.eup %1635 }
 0x3e1   : > { %v1222_v16 = vadd.f32 1.0, %v1636_v11 }
 0x3e2   : > { %v1638_v17 = vpop.eup %1637 }
 0x3e3   : > { %1641 = vrcp.f32 %v1222_v16  ;;  %v1221_v18 = vadd.f32 1.0, %v1638_v17 }
 0x3e5   : > { %1643 = vrcp.f32 %v1221_v18 }
 0x3e8   : > { %v1640_v19 = vpop.eup %1639 }
 0x3e9   : > { %1245 = vst.msk [vmem:[%s2032_s28 + $0x18] sm:$0xff] %vm1241_vm3, %v1640_v19 }
 0x3f0   : > { %v1642_v21 = vpop.eup %1641 }
 0x3f1   : > { %1247 = vst.msk [vmem:[%s2032_s28 + $0x28] sm:$0xff] %vm1241_vm3, %v1642_v21 }
 0x3f2   : > { %v1644_v22 = vpop.eup %1643 }
 0x3f3   : > { %1246 = vst.msk [vmem:[%s2032_s28 + $0x20] sm:$0xff] %vm1241_vm3, %v1644_v22 }
 0x3fa   : > { %v1052_v24 = vpop.f32.mrf.mxu1  ;;  %v1575_v25 = vpop.f32.mrf.mxu0 }
 0x3fb   : > { %v1053_v26 = vadd.f32 %v1052_v24, %v1993_v55  ;;  %v1145_v27 = vadd.f32 %v1575_v25, %v1930_v28 }
 0x3fc   : > { %v1561_v29 = vpop.f32.mrf.mxu1  ;;  %v1133_v30 = vpop.f32.mrf.mxu0 }
 0x3fd   : > { %v1144_v33 = vadd.f32 %v1133_v30, %v1934_v31  ;;  %v1160_v34 = vmul.f32 %v1999_v58, %v1145_v27  ;;  %1056 = vst.msk [vmem:[%s348_s30] sm:$0xff] %vm569_vm1, %v1053_v26 }
 0x3ff   : > { %v1182_v36 = vsel %vm569_vm1, %v1160_v34, 0.0  ;;  %v1159_v3 = vmul.f32 %v1999_v58, %v1144_v33 }
 0x400   : > { %1183 = vadd.xlane.f32.xlu1 %v1182_v36 }
 0x401   : > { %v1179_v4 = vsel %vm569_vm1, %v1159_v3, 0.0 }
 0x402   : > { %1180 = vadd.xlane.f32.xlu0 %v1179_v4 }
 0x403   : > { %1666 = shalt.err (!%p1663_p3)
}
 0x404   : > { %s1667_s7 = scalar_lea.hbm %s1270_s22, 128  ;;  %s1671_s10 = scalar_lea.hbm %s2142_s9, 256 }
 0x405   : > { %p1668_p4 = scmp.ne.s32.totalorder %s1270_s22, %s1667_s7  ;;  %p1672_p9 = scmp.lt.s32.totalorder %s1270_s22, %s2142_s9 }
 0x406   : > { %p1673_p10 = scmp.lt.s32.totalorder %s1671_s10, %s1667_s7 }
 0x407   : > { %p1669_p7 = pnand %p1668_p4, %p1809_p5 }
 0x408   : > { %p1674_p11 = por %p1673_p10, %p1672_p9 }
 0x409   : > { %p1670_p8 = pneg %p1669_p7 }
 0x40b   : > { %p1675_p12 = pnand %p1674_p11, %p1670_p8 }
 0x40d   : > { %1678 = shalt.err (!%p1675_p12)
}
 0x40e   : > { %1580 = dma.vmem_to_hbm [thread:$0]  (%p1809_p5), %s1273_s15, 128, %s1270_s22, %s1256_s23   ;;  %v567_v28 = vadd.f32 %v2022_v12, %v2024_v10  ;;  %v566_v55 = vadd.f32 %v2022_v12, %v2046_v35 }
 0x489   : > { %v1184_v31 = vpop.xlane.xlu1 %1183 }
 0x48a   : > { %v1192_v58 = vadd.f32 %v1184_v31, %v567_v28 }
 0x48b   : > { %v1181_v37 = vpop.xlane.xlu0 %1180 }
 0x48c   : > { %v1413_v38 = vmul.f32 -1.442695, %v1192_v58  ;;  %v1191_v39 = vadd.f32 %v1181_v37, %v566_v55 }
 0x48e   : > { %1645 = vpow2.f32 %v1413_v38  ;;  %v1412_v40 = vmul.f32 -1.442695, %v1191_v39 }
 0x490   : > { %1647 = vpow2.f32 %v1412_v40 }
 0x49b   : > { %v1646_v13 = vpop.eup %1645 }
 0x49c   : > { %v1224_v41 = vadd.f32 1.0, %v1646_v13 }
 0x49d   : > { %v1648_v42 = vpop.eup %1647 }
 0x49e   : > { %1649 = vrcp.f32 %v1224_v41  ;;  %v1223_v14 = vadd.f32 1.0, %v1648_v42 }
 0x4a0   : > { %1651 = vrcp.f32 %v1223_v14 }
 0x4ab   : > { %v1650_v10 = vpop.eup %1649 }
 0x4ac   : > { %1249 = vst.msk [vmem:[%s2032_s28 + $0x38] sm:$0xff] %vm1241_vm3, %v1650_v10 }
 0x4ad   : > { %v1652_v43 = vpop.eup %1651 }
 0x4ae   : > { %1248 = vst.msk [vmem:[%s2032_s28 + $0x30] sm:$0xff] %vm1241_vm3, %v1652_v43 }
 0x4af PF: > { %p1586_p5 = scmp.ge.s32.totalorder %s1713_s14, 2  ;;  %s1292_s20 = sand.u32 1, %s1701_s11  }
 0x4b0   : > { %s1293_s15 = scalar_lea.sflag [#allocation4], %s1292_s20 }
 0x4b1   : > { %p1583_p13 = pnand %p1586_p5, %p1813_p6 }
 0x4b3   : > { %p1584_p0 = pneg %p1583_p13 }
 0x4b5   : > { %1696 = dma.done.wait (%p1584_p0), %s1293_s15, 128  }
 0x4b6   : > { %1698 = vsyncadd (%p1584_p0), %s1293_s15, 4294967168  ;;  %p22_p1 = scmp.ge.s32.totalorder %s1796_s16, 4   ;;  %s2145_s11 = smov %s1705_s12 }
 0x4b7   : > { %s2146_s12 = smov %s1709_s13  ;;  %s2147_s13 = smov %s1807_s19 }
 0x4b8   : > { %s2148_s14 = smov %s1796_s16  ;;  %24 = sbr.rel (!%p22_p1) target bundleno = 6 (0x6), region = 102 }
 0x4bd   :  { %1298 = vsyncpa [#allocation4], 1 }
 0x4be   :  { %1300 = vsyncpa [#allocation4 + $0x1], 1 }

</bundles_post_ra>
